<compile_context>
chip_gen: v7x
topology: tpu7x:2x2x1
jax: 0.10.0
libtpu: 0.0.40
codegen_flags: <defaults>
</compile_context>

<pallas_src>
import functools
import math

import jax
import jax.numpy as jnp
from jax.experimental import pallas as pl
from jax.experimental.pallas import tpu as pltpu


def _time_embed_kernel(t_ref, w1_ref, b_ref, w2_ref, o_ref,
                       *, half, embed_dim, coef, silu_bf16):
    # Sinusoidal embedding generated fully in-kernel. freqs is a single (1, half)
    # row (one EUP exp vreg per grid step) broadcast over the batch sublanes.
    j = jax.lax.broadcasted_iota(jnp.int32, (1, half), 1).astype(jnp.float32)
    freqs = jnp.exp(coef * j)                            # (1, half)
    args = t_ref[...] * freqs                            # (TB, 1) * (1, half)
    cos_e = jnp.cos(args)
    sin_e = jnp.sin(args)
    # TODO(synk): for large-B serving, pack 4 batch rows per vreg row so the
    # (TB, half) cos/sin stage is lane-dense; skipped (no effect at small B).

    # Linear1 as two accumulating GEMMs against static views of W1 (no concat /
    # lane relayout); bf16 MXU inputs, f32 accumulation; bias add in f32.
    wdt = w1_ref.dtype
    h = (jnp.dot(cos_e.astype(wdt), w1_ref[:half, :],
                 preferred_element_type=jnp.float32)
         + jnp.dot(sin_e.astype(wdt), w1_ref[half:, :],
                   preferred_element_type=jnp.float32)
         + b_ref[:, :2 * embed_dim])

    if silu_bf16:
        # v6e/v7x: bf16 VPU/EUP -> ~2x fewer sigmoid pushes; h is cast to bf16
        # for GEMM2 anyway.
        hb = h.astype(jnp.bfloat16)
        h2 = hb * jax.nn.sigmoid(hb)
    else:
        # v5e (no bf16 VPU/EUP): SiLU stays in f32.
        h2 = h * jax.nn.sigmoid(h)

    o_ref[...] = (jnp.dot(h2.astype(w2_ref.dtype), w2_ref[...],
                          preferred_element_type=jnp.float32)
                  + b_ref[:, 2 * embed_dim:]).astype(o_ref.dtype)


def _round_up(x, m):
    return (x + m - 1) // m * m


def _default_silu_bf16():
    # bf16 SiLU only where the VPU/EUP have a bf16 path (v6e / v7x).
    try:
        kind = jax.devices()[0].device_kind.lower()
    except Exception:
        return False
    return ("v6" in kind) or ("v7" in kind)


def learnable_time_embedding(timesteps, params, *, embed_dim, max_period=10000,
                             out_dtype=jnp.float32, silu_bf16=None):
    """Pallas forward of LearnableTimeEmbedding. timesteps: (B,), any numeric dtype."""
    assert embed_dim % 2 == 0, "even embed_dim assumed"
    B = timesteps.shape[0]
    half = embed_dim // 2
    coef = -math.log(max_period) / half
    if silu_bf16 is None:
        silu_bf16 = _default_silu_bf16()

    # Batch tiling: single step at tiny B; >=2 steps once B >= 16 (both v7x TCs get
    # work via "parallel"); cap 512 rows to amortize per-step overhead at large B.
    TB = min(_round_up(max(B // 2, 8), 8), 512)
    Bp = _round_up(B, TB)
    t_col = timesteps.astype(jnp.float32).reshape(B, 1)
    if Bp != B:
        t_col = jnp.pad(t_col, ((0, Bp - B), (0, 0)))

    w1, b12, w2 = params["w1"], params["b"], params["w2"]

    def resident(shape):
        return pl.BlockSpec(shape, lambda i: (0, 0))

    out_bytes = jnp.dtype(out_dtype).itemsize
    flops = 2 * Bp * embed_dim * (2 * embed_dim) * 2               # GEMM1 (split) + GEMM2
    transcendentals = Bp * (2 * half + 2 * embed_dim) + (Bp // TB) * half
    bytes_accessed = ((w1.size + w2.size) * 2 + b12.size * 4       # bf16 weights, f32 bias
                      + Bp * 4 + Bp * embed_dim * out_bytes)

    out = pl.pallas_call(
        functools.partial(_time_embed_kernel, half=half, embed_dim=embed_dim,
                          coef=coef, silu_bf16=silu_bf16),
        out_shape=jax.ShapeDtypeStruct((Bp, embed_dim), out_dtype),
        grid=(Bp // TB,),
        in_specs=[
            pl.BlockSpec((TB, 1), lambda i: (i, 0)),               # timesteps column
            resident((embed_dim, 2 * embed_dim)),                  # W1 (sliced in-kernel)
            resident((1, 3 * embed_dim)),                          # [b1 | b2]
            resident((2 * embed_dim, embed_dim)),                  # W2
        ],
        out_specs=pl.BlockSpec((TB, embed_dim), lambda i: (i, 0)),
        compiler_params=pltpu.CompilerParams(
            dimension_semantics=("parallel",)),
        cost_estimate=pl.CostEstimate(flops=flops,
                                      transcendentals=transcendentals,
                                      bytes_accessed=bytes_accessed),
    )(t_col, w1, b12, w2)
    return out[:B] if Bp != B else out


def init_params(key, embed_dim, dtype=jnp.bfloat16):
    """nn.Linear-style init; W1 stored whole (bf16), biases packed as [b1 | b2] (f32)."""
    d, h = embed_dim, embed_dim * 2
    k1, k2, k3, k4 = jax.random.split(key, 4)
    lim1 = 1.0 / math.sqrt(d)
    lim2 = 1.0 / math.sqrt(h)
    b1 = jax.random.uniform(k2, (1, h), jnp.float32, -lim1, lim1)
    b2 = jax.random.uniform(k4, (1, d), jnp.float32, -lim2, lim2)
    return {
        "w1": jax.random.uniform(k1, (d, h), jnp.float32, -lim1, lim1).astype(dtype),
        "w2": jax.random.uniform(k3, (h, d), jnp.float32, -lim2, lim2).astype(dtype),
        "b": jnp.concatenate([b1, b2], axis=-1),                   # (1, 3*d)
    }


def _reference(timesteps, params, embed_dim, max_period=10000):
    """Pure-JAX f32 reference mirroring the PyTorch module math (same bf16 weights)."""
    half = embed_dim // 2
    d = embed_dim
    freqs = jnp.exp(-math.log(max_period) * jnp.arange(half, dtype=jnp.float32) / half)
    args = timesteps.astype(jnp.float32)[:, None] * freqs[None]
    emb = jnp.concatenate([jnp.cos(args), jnp.sin(args)], axis=-1)
    w1 = params["w1"].astype(jnp.float32)
    w2 = params["w2"].astype(jnp.float32)
    b1 = params["b"][:, :2 * d]
    b2 = params["b"][:, 2 * d:]
    h = emb @ w1 + b1
    h = h * jax.nn.sigmoid(h)
    return h @ w2 + b2


if __name__ == "__main__":
    EMBED_DIM = 64
    BATCH = 8

    key = jax.random.PRNGKey(0)
    k_t, k_p = jax.random.split(key)
    timesteps = jax.random.randint(k_t, (BATCH,), 0, 1000).astype(jnp.int32)
    params = init_params(k_p, EMBED_DIM)

    out = learnable_time_embedding(timesteps, params, embed_dim=EMBED_DIM)
    out = jax.block_until_ready(out)

    ref = _reference(timesteps, params, EMBED_DIM)
    assert out.shape == (BATCH, EMBED_DIM)
    assert jnp.allclose(out, ref, atol=2e-2, rtol=2e-2), "mismatch vs pure-JAX reference"

    print("KERNEL_OK")
</pallas_src>

<mosaic_0001>
module attributes {stable_mosaic.version = 11 : i64} {
  func.func @_time_embed_kernel(%arg0: i32, %arg1: memref<8x1xf32, #tpu.memory_space<vmem>>, %arg2: memref<64x128xbf16, #tpu.memory_space<vmem>>, %arg3: memref<1x192xf32, #tpu.memory_space<vmem>>, %arg4: memref<128x64xbf16, #tpu.memory_space<vmem>>, %arg5: memref<8x64xf32, #tpu.memory_space<vmem>>) attributes {dimension_semantics = [#tpu.dimension_semantics<parallel>], iteration_bounds = array<i64: 1>, scalar_prefetch = 0 : i64, scratch_operands = 0 : i64, tpu.core_type = #tpu.core_type<tc>, window_params = [{transform_indices = @transform_0, window_bounds = array<i64: 8, 1>}, {pipeline_mode = #tpu.pipeline_mode<synchronous>, transform_indices = @transform_1, window_bounds = array<i64: 64, 128>}, {pipeline_mode = #tpu.pipeline_mode<synchronous>, transform_indices = @transform_2, window_bounds = array<i64: 1, 192>}, {pipeline_mode = #tpu.pipeline_mode<synchronous>, transform_indices = @transform_3, window_bounds = array<i64: 128, 64>}, {transform_indices = @transform_4, window_bounds = array<i64: 8, 64>}]} {
    %0 = tpu.iota {dimensions = array<i32: 1>} : vector<1x32xi32>
    %1 = arith.sitofp %0 : vector<1x32xi32> to vector<1x32xf32>
    %cst = arith.constant -0.287823141 : f32
    %2 = vector.broadcast %cst : f32 to vector<1x32xf32>
    %3 = arith.mulf %2, %1 : vector<1x32xf32>
    %4 = math.exp %3 : vector<1x32xf32>
    %c0 = arith.constant 0 : index
    %c0_0 = arith.constant 0 : index
    %5 = vector.load %arg1[%c0, %c0_0] : memref<8x1xf32, #tpu.memory_space<vmem>>, vector<8x1xf32>
    %6 = vector.broadcast %5 : vector<8x1xf32> to vector<8x32xf32>
    %7 = vector.broadcast %4 : vector<1x32xf32> to vector<8x32xf32>
    %8 = arith.mulf %6, %7 : vector<8x32xf32>
    %9 = math.cos %8 : vector<8x32xf32>
    %10 = math.sin %8 : vector<8x32xf32>
    %11 = arith.truncf %9 : vector<8x32xf32> to vector<8x32xbf16>
    %c0_1 = arith.constant 0 : index
    %c0_2 = arith.constant 0 : index
    %12 = vector.load %arg2[%c0_1, %c0_2] : memref<64x128xbf16, #tpu.memory_space<vmem>>, vector<32x128xbf16>
    %cst_3 = arith.constant dense<0.000000e+00> : vector<8x128xf32>
    %13 = tpu.matmul %11, %12, %cst_3 {dimension_numbers = #tpu.dot_dimension_numbers<[1], [0], [0], [1], [0, 0, 1, 1], [], []>} : vector<8x32xbf16>, vector<32x128xbf16>, vector<8x128xf32> -> vector<8x128xf32>
    %14 = arith.truncf %10 : vector<8x32xf32> to vector<8x32xbf16>
    %c32 = arith.constant 32 : index
    %c0_4 = arith.constant 0 : index
    %15 = vector.load %arg2[%c32, %c0_4] : memref<64x128xbf16, #tpu.memory_space<vmem>>, vector<32x128xbf16>
    %cst_5 = arith.constant dense<0.000000e+00> : vector<8x128xf32>
    %16 = tpu.matmul %14, %15, %cst_5 {dimension_numbers = #tpu.dot_dimension_numbers<[1], [0], [0], [1], [0, 0, 1, 1], [], []>} : vector<8x32xbf16>, vector<32x128xbf16>, vector<8x128xf32> -> vector<8x128xf32>
    %17 = arith.addf %13, %16 : vector<8x128xf32>
    %c0_6 = arith.constant 0 : index
    %c0_7 = arith.constant 0 : index
    %18 = vector.load %arg3[%c0_6, %c0_7] : memref<1x192xf32, #tpu.memory_space<vmem>>, vector<1x128xf32>
    %19 = vector.broadcast %18 : vector<1x128xf32> to vector<8x128xf32>
    %20 = arith.addf %17, %19 : vector<8x128xf32>
    %21 = arith.negf %20 : vector<8x128xf32>
    %22 = math.exp %21 : vector<8x128xf32>
    %cst_8 = arith.constant 1.000000e+00 : f32
    %23 = vector.broadcast %cst_8 : f32 to vector<8x128xf32>
    %24 = arith.addf %23, %22 : vector<8x128xf32>
    %25 = arith.divf %23, %24 : vector<8x128xf32>
    %26 = arith.mulf %20, %25 : vector<8x128xf32>
    %27 = arith.truncf %26 : vector<8x128xf32> to vector<8x128xbf16>
    %c0_9 = arith.constant 0 : index
    %c0_10 = arith.constant 0 : index
    %28 = vector.load %arg4[%c0_9, %c0_10] : memref<128x64xbf16, #tpu.memory_space<vmem>>, vector<128x64xbf16>
    %cst_11 = arith.constant dense<0.000000e+00> : vector<8x64xf32>
    %29 = tpu.matmul %27, %28, %cst_11 {dimension_numbers = #tpu.dot_dimension_numbers<[1], [0], [0], [1], [0, 0, 1, 1], [], []>} : vector<8x128xbf16>, vector<128x64xbf16>, vector<8x64xf32> -> vector<8x64xf32>
    %c0_12 = arith.constant 0 : index
    %c128 = arith.constant 128 : index
    %30 = vector.load %arg3[%c0_12, %c128] : memref<1x192xf32, #tpu.memory_space<vmem>>, vector<1x64xf32>
    %31 = vector.broadcast %30 : vector<1x64xf32> to vector<8x64xf32>
    %32 = arith.addf %29, %31 : vector<8x64xf32>
    %c0_13 = arith.constant 0 : index
    %c0_14 = arith.constant 0 : index
    %33 = vector.load %arg5[%c0_13, %c0_14] : memref<8x64xf32, #tpu.memory_space<vmem>>, vector<8x64xf32>
    tpu.vector_store %arg5[%c0_13, %c0_14], %32 {strides = array<i32>} : memref<8x64xf32, #tpu.memory_space<vmem>>, vector<8x64xf32>,
    return
  }
  func.func @transform_0(%arg0: i32) -> (i32, i32) {
    %c0_i32 = arith.constant 0 : i32
    %c0_i32_0 = arith.constant 0 : i32
    return %arg0, %c0_i32 : i32, i32
  }
  func.func @transform_1(%arg0: i32) -> (i32, i32) {
    %c0_i32 = arith.constant 0 : i32
    %c0_i32_0 = arith.constant 0 : i32
    %c0_i32_1 = arith.constant 0 : i32
    return %c0_i32, %c0_i32_0 : i32, i32
  }
  func.func @transform_2(%arg0: i32) -> (i32, i32) {
    %c0_i32 = arith.constant 0 : i32
    %c0_i32_0 = arith.constant 0 : i32
    %c0_i32_1 = arith.constant 0 : i32
    return %c0_i32, %c0_i32_0 : i32, i32
  }
  func.func @transform_3(%arg0: i32) -> (i32, i32) {
    %c0_i32 = arith.constant 0 : i32
    %c0_i32_0 = arith.constant 0 : i32
    %c0_i32_1 = arith.constant 0 : i32
    return %c0_i32, %c0_i32_0 : i32, i32
  }
  func.func @transform_4(%arg0: i32) -> (i32, i32) {
    %c0_i32 = arith.constant 0 : i32
    %c0_i32_0 = arith.constant 0 : i32
    return %arg0, %c0_i32 : i32, i32
  }
}

</mosaic_0001>

<bundles_post_ra>
// kernel: tpu_custom_call.1
= control target key start
LH: loop header
LB: loop body
LE: loop exit
PB: predicated region body
PF: predicated region fallthrough
CT: control target
= control target key end

     0   :  { %v640_v1 = vmov 0   ;;  %s775_s0 = inlined_call_operand.vmem [shape: f32[8,1], index: 0, kind: input, shape index: {}]   ;;  %s776_s1 = inlined_call_operand.vmem [shape: bf16[64,128], index: 1, kind: input, shape index: {}]   ;;  %s777_s2 = inlined_call_operand.vmem [shape: f32[1,192], index: 2, kind: input, shape index: {}]   ;;  %s778_s3 = inlined_call_operand.vmem [shape: bf16[128,64], index: 3, kind: input, shape index: {}]   ;;  %s779_s4 = inlined_call_operand.hbm [shape: f32[8,64], index: 4, kind: output, shape index: {}]  }
   0x1   :  { %v25_v0 = vld [vmem:[%s775_s0] sm:$0xff]  ;;  %593 = vset.pattern.permute.xlu0 %v640_v1 }
   0x2   :  { %28 = vperm.xlu0 %593, %v25_v0  }
   0x3   :  { %9 = vsyncpa [#allocation3], 0  ;;  %v594_v2 = vld [vmem:[%s776_s1 + $0x10] sm:$0xff]   ;;  %v641_v3 = vmov 0.0   ;;  %vm642_vm0 = vmmov 0   ;;  %v595_v4 = vld [vmem:[%s776_s1 + $0x18] sm:$0xff]   ;;  %v19_v5 = vlaneseq }
   0x4   :  { %543 = vmatprep.subr.bf16.mxu1 %v641_v3  ;;  %547 = vmatprep.mubr.msk.bf16.mxu1 %vm642_vm0, %v641_v3  ;;  %v643_v23 = vmov 683565275   ;;  %v644_v25 = vmov 2475754826   ;;  %v645_v28 = vmov 2131351028  }
   0x5   :  { %544 = vmatpush3.bf16.msra.mxu1 %v594_v2  ;;  %559 = vmatprep.subr.bf16.mxu0 %v641_v3  ;;  %v20_v6 = vand.u32 127, %v19_v5  ;;  %v646_v31 = vmov 2102212464   ;;  %v647_v34 = vmov 920167782   ;;  %s649_s16 = smov [#allocation2]  }
   0x6   :  { %545 = vmatprep.subr.bf16.mxu1 %v641_v3  ;;  %575 = vmatprep.mubr.msk.bf16.mxu0 %vm642_vm0, %v641_v3  ;;  %v648_v37 = vmov 1326507024   ;;  %s495_s17 = sshll.u32 %s649_s16, 4  ;;  %s496_s17 = int_to_ptr.vmem [resolvable:$true] %s495_s17 }
   0x7   :  { %v21_v7 = vcvt.s32.f32 %v20_v6  ;;  %s616_s18 = scalar_lea.vmem %s496_s17, 128  ;;  %p621_p1 = scmp.lt.s32.totalorder %s496_s17, %s496_s17 }
   0x8   :  { %p617_p0 = scmp.ne.s32.totalorder %s496_s17, %s616_s18  ;;  %p622_p2 = scmp.lt.s32.totalorder %s616_s18, %s616_s18 }
   0x9   :  { %546 = vmatpush3.bf16.msra.mxu1 %v595_v4  ;;  %v22_v8 = vmul.f32 -0.28782314, %v21_v7 }
   0xa   :  { %551 = vmatprep.subr.bf16.mxu1 %v641_v3  ;;  %p623_p3 = por %p622_p2, %p621_p1 }
   0xb   :  { %v23_v9 = vmul.f32 1.442695, %v22_v8 }
   0xc   :  { %p624_p4 = pnand %p623_p3, %p617_p0 }
   0xd   :  { %606 = vpow2.f32 %v23_v9 }
  0x17   :  { %v607_v10 = vpop.eup %606 }
  0x81   :  { %v29_v11 = vpop.permute.xlu0 %28 }
  0x82   :  { %v692_v12 = vmul.f32 %v607_v10, %v29_v11 }
  0x84   :  { %v35_v13 = vand.u32 2139095040, %v692_v12  ;;  %v32_v17 = vand.u32 2147483647, %v692_v12  ;;  %vm34_vm8 = vcmp.lt.s32.totalorder %v692_v12, 0  ;;  %vm124_vm13 = vweird.f32 %v692_v12 }
  0x86   :  { %v36_v14 = vshrl.u32 %v35_v13, 23  ;;  %v39_v20 = vand.u32 8388607, %v32_v17  ;;  %vm33_vm9 = vcmp.le.f32.partialorder %v32_v17, 0.7853982 }
  0x88   :  { %v503_v15 = vadd.s32 4294967169, %v36_v14  ;;  %v40_v39 = vor.u32 8388608, %v39_v20 }
  0x8a   :  { %v42_v16 = vadd.s32 1, %v503_v15  ;;  %v80_v53 = vshll.u32 %v40_v39, 8 }
  0x8c   :  { %vm43_vm1 = vcmp.gt.s32.totalorder %v42_v16, 0 }
  0x8d   :  { %v44_v18 = vsel %vm43_vm1, %v42_v16, 0  ;;  %vm261_vm1 = vcmask 261120  }
  0x8e   :  { %v46_v19 = vand.u32 31, %v44_v18  ;;  %v45_v22 = vshrl.u32 %v44_v18, 5 }
  0x90   :  { %v47_v21 = vsub.s32 32, %v46_v19  ;;  %v49_v24 = vshll.u32 %v643_v23, %v46_v19  ;;  %v52_v26 = vshll.u32 %v644_v25, %v46_v19  ;;  %v55_v30 = vshll.u32 %v645_v28, %v46_v19 }
  0x91   :  { %v58_v33 = vshll.u32 %v646_v31, %v46_v19  ;;  %v61_v36 = vshll.u32 %v647_v34, %v46_v19  ;;  %vm64_vm2 = vcmp.lt.s32.totalorder %v45_v22, 1  ;;  %vm67_vm3 = vcmp.lt.s32.totalorder %v45_v22, 4 }
  0x92   :  { %v50_v27 = vshrl.u32 %v644_v25, %v47_v21  ;;  %v53_v29 = vshrl.u32 %v645_v28, %v47_v21  ;;  %v56_v32 = vshrl.u32 %v646_v31, %v47_v21  ;;  %v59_v35 = vshrl.u32 %v647_v34, %v47_v21 }
  0x93   :  { %v62_v38 = vshrl.u32 %v648_v37, %v47_v21  ;;  %v48_v48 = vshrl.u32 %v643_v23, %v47_v21  ;;  %vm66_vm4 = vcmp.lt.s32.totalorder %v45_v22, 3  ;;  %vm65_vm5 = vcmp.lt.s32.totalorder %v45_v22, 2 }
  0x94   :  { %v51_v40 = vor.u32 %v50_v27, %v49_v24  ;;  %v54_v41 = vor.u32 %v53_v29, %v52_v26  ;;  %v57_v42 = vor.u32 %v56_v32, %v55_v30  ;;  %v60_v43 = vor.u32 %v59_v35, %v58_v33 }
  0x95   :  { %v63_v44 = vor.u32 %v62_v38, %v61_v36 }
  0x96   :  { %v69_v45 = vsel %vm67_vm3, %v57_v42, 2102212464  ;;  %v72_v46 = vsel %vm64_vm2, %v51_v40, %v54_v41  ;;  %v76_v47 = vsel %vm64_vm2, %v54_v41, %v57_v42  ;;  %v73_v49 = vsel %vm67_vm3, %v60_v43, 920167782 }
  0x97   :  { %v77_v50 = vsel %vm67_vm3, %v63_v44, 1326507024  ;;  %v74_v51 = vsel %vm66_vm4, %v57_v42, %v73_v49  ;;  %v68_v54 = vsel %vm64_vm2, %v48_v48, %v51_v40  ;;  %v70_v55 = vsel %vm66_vm4, %v54_v41, %v69_v45  ;;  %v596_v45 = vld [vmem:[%s776_s1] sm:$0xff]   ;;  %v597_v48 = vld [vmem:[%s776_s1 + $0x8] sm:$0xff]  }
  0x98   :  { %v78_v52 = vsel %vm66_vm4, %v60_v43, %v77_v50  ;;  %v75_v56 = vsel %vm65_vm5, %v72_v46, %v74_v51  ;;  %v71_v62 = vsel %vm65_vm5, %v68_v54, %v70_v55  ;;  %v598_v51 = vld [vmem:[%s778_s3] sm:$0xff]   ;;  %v603_v55 = vld [vmem:[%s778_s3 + $0x28] sm:$0xff]  }
  0x99   :  { %v79_v57 = vsel %vm65_vm5, %v76_v47, %v78_v52  ;;  %v701_v60 = vmul.u32.u64.low %v80_v53, %v75_v56  ;;  %v702_v61 = vmul.u32.u64.high %v80_v53, %v75_v56, %v701_v60  ;;  %v87_v0 = vmul.u32 %v80_v53, %v71_v62  ;;  %560 = vmatpush3.bf16.msra.mxu0 %v598_v51  ;;  %v599_v52 = vld [vmem:[%s778_s3 + $0x8] sm:$0xff]   ;;  %v602_v54 = vld [vmem:[%s778_s3 + $0x20] sm:$0xff]   ;;  %v604_v56 = vld [vmem:[%s778_s3 + $0x30] sm:$0xff]  }
  0x9a   :  { %v698_v58 = vmul.u32.u64.low %v80_v53, %v79_v57  ;;  %v699_v59 = vmul.u32.u64.high %v80_v53, %v79_v57, %v698_v58  ;;  %561 = vmatprep.subr.bf16.mxu0 %v641_v3  ;;  %v601_v53 = vld [vmem:[%s778_s3 + $0x18] sm:$0xff]  }
  0x9b   :  { %v90_v63 = vadd.s32 1, %v702_v61  ;;  %v605_v57 = vld [vmem:[%s778_s3 + $0x38] sm:$0xff]  }
  0x9c   :  { %vm89_vm6 = vc.u32 %v699_v59, %v701_v60  ;;  %v88_v14 = vadd.s32 %v701_v60, %v699_v59 }
  0x9d   :  { %v91_v1 = vsel %vm89_vm6, %v90_v63, %v702_v61  ;;  %562 = vmatpush3.bf16.msra.mxu0 %v599_v52  ;;  %v517_v63 = vld [vmem:[%s777_s2] ss:$0 sm:$0xff] }
  0x9e   :  { %v92_v2 = vadd.s32 %v91_v1, %v87_v0  ;;  %563 = vmatprep.subr.bf16.mxu0 %v641_v3 }
  0xa0   :  { %v93_v4 = vadd.s32 536870912, %v92_v2 }
  0xa2   :  { %v94_v5 = vshrl.u32 %v93_v4, 30 }
  0xa4   :  { %v95_v6 = vshll.u32 %v94_v5, 30  ;;  %v118_v27 = vsub.s32 4, %v94_v5 }
  0xa6   :  { %v96_v7 = vsub.s32 %v92_v2, %v95_v6  ;;  %v119_v30 = vsel %vm34_vm8, %v118_v27, %v94_v5 }
  0xa7   :  { %v121_v32 = vsel %vm33_vm9, 0, %v119_v30 }
  0xa8   :  { %v98_v8 = vsub.s32 0, %v96_v7  ;;  %v228_v33 = vadd.s32 3, %v121_v32  ;;  %v125_v37 = vand.u32 3, %v121_v32 }
  0xaa   :  { %v504_v9 = vmin.u32 %v98_v8, %v96_v7  ;;  %v229_v34 = vand.u32 3, %v228_v33  ;;  %vm127_vm14 = vcmp.eq.s32.totalorder %v125_v37, 0  ;;  %vm130_vm15 = vcmp.eq.s32.totalorder %v125_v37, 2 }
  0xab   :  { %vm126_vm2 = vcmp.lt.s32.totalorder %v125_v37, 2 }
  0xac   :  { %v100_v10 = vclz %v504_v9  ;;  %vm234_vm10 = vcmp.eq.s32.totalorder %v229_v34, 2  ;;  %vm231_vm11 = vcmp.eq.s32.totalorder %v229_v34, 0  ;;  %vm230_vm12 = vcmp.lt.s32.totalorder %v229_v34, 2 }
  0xae   :  { %v505_v11 = vadd.s32 4294967294, %v100_v10 }
  0xb0   :  { %vm506_vm7 = vcmp.lt.s32.totalorder %v505_v11, 0 }
  0xb1   :  { %v103_v13 = vsel %vm506_vm7, 0, %v505_v11  ;;  %v519_v11 = vld [vmem:[%s777_s2 + $0x1] ss:$0 sm:$0xff] }
  0xb2   :  { %v104_v15 = vsub.s32 32, %v103_v13  ;;  %v108_v16 = vsub.s32 4294967266, %v103_v13  ;;  %v105_v18 = vshll.u32 %v96_v7, %v103_v13 }
  0xb4   :  { %v106_v19 = vshrl.u32 %v88_v14, %v104_v15  ;;  %v109_v20 = vadd.s32 127, %v108_v16 }
  0xb6   :  { %v107_v21 = vor.u32 %v106_v19, %v105_v18  ;;  %v110_v22 = vshll.u32 %v109_v20, 23 }
  0xb8   :  { %v111_v23 = vor.u32 4788187, %v110_v22  ;;  %v114_v25 = vcvt.s32.f32 %v107_v21 }
  0xba   :  { %v112_v24 = vand.u32 2147483647, %v111_v23 }
  0xbc   :  { %v115_v26 = vmul.f32 %v114_v25, %v112_v24 }
  0xbe   :  { %v116_v28 = vxor.u32 2147483648, %v115_v26 }
  0xc0   :  { %v117_v29 = vsel %vm34_vm8, %v116_v28, %v115_v26 }
  0xc1   :  { %v120_v31 = vsel %vm33_vm9, %v692_v12, %v117_v29  ;;  %v600_v12 = vld [vmem:[%s778_s3 + $0x10] sm:$0xff]  }
  0xc2   :  { %608 = vcosq.f32 %v120_v31  ;;  %564 = vmatpush3.bf16.msra.mxu0 %v600_v12 }
  0xc3   :  { %610 = vsinq.f32 %v120_v31  ;;  %565 = vmatprep.subr.bf16.mxu0 %v641_v3 }
  0xc6   :  { %566 = vmatpush3.bf16.msra.mxu0 %v601_v53 }
  0xc7   :  { %567 = vmatprep.subr.bf16.mxu0 %v641_v3 }
  0xca   :  { %568 = vmatpush3.bf16.msra.mxu0 %v602_v54 }
  0xcb   :  { %569 = vmatprep.subr.bf16.mxu0 %v641_v3 }
  0xcc   :  { %v609_v35 = vpop.eup %608 }
  0xcd   :  { %v611_v36 = vpop.eup %610  ;;  %v131_v38 = vxor.u32 2147483648, %v609_v35 }
  0xce   :  { %v128_v39 = vxor.u32 2147483648, %v611_v36  ;;  %570 = vmatpush3.bf16.msra.mxu0 %v603_v55 }
  0xcf   :  { %v236_v40 = vsel %vm234_vm10, %v131_v38, %v611_v36  ;;  %v132_v43 = vsel %vm130_vm15, %v131_v38, %v611_v36  ;;  %571 = vmatprep.subr.bf16.mxu0 %v641_v3 }
  0xd0   :  { %v233_v41 = vsel %vm231_vm11, %v609_v35, %v128_v39  ;;  %v129_v42 = vsel %vm127_vm14, %v609_v35, %v128_v39 }
  0xd1   :  { %v237_v17 = vsel %vm230_vm12, %v233_v41, %v236_v40  ;;  %v133_v47 = vsel %vm126_vm2, %v129_v42, %v132_v43 }
  0xd2   :  { %v238_v44 = vsel %vm124_vm13, nan, %v237_v17  ;;  %v134_v49 = vsel %vm124_vm13, nan, %v133_v47  ;;  %572 = vmatpush3.bf16.msra.mxu0 %v604_v56 }
  0xd3   :  { %v244_v46 = vpack.c.bf16 %v238_v44, %v238_v44  ;;  %v239_v50 = vpack.c.bf16 %v134_v49, %v134_v49  ;;  %573 = vmatprep.subr.bf16.mxu0 %v641_v3 }
  0xd5   :  { %548 = vmatmul.mubr.msk.bf16.vlgmr.msra.gmra.mrb[0].mxu1 %vm261_vm1, %v244_v46 }
  0xd6   :  { %552 = vmatpush3.bf16.msra.mxu1 %v596_v45  ;;  %555 = vmatprep.mubr.msk.bf16.mxu1 %vm642_vm0, %v641_v3  ;;  %vm487_vm0 = vcmask 523264  }
  0xd7   :  { %553 = vmatprep.subr.bf16.mxu1 %v641_v3  ;;  %574 = vmatpush3.bf16.msra.mxu0 %v605_v57 }
  0xda   :  { %554 = vmatpush3.bf16.msra.mxu1 %v597_v48 }
  0xdd   :  { %556 = vmatmul.mubr.msk.bf16.vlgmr.msra.gmra.mrb[4].mxu1 %vm261_vm1, %v239_v50 }
 0x1a8   :  { %v299_v58 = vpop.f32.mrb[0].mxu1 }
 0x1a9   :  { %v549_v59 = vpop.f32.mrb[1].mxu1 }
 0x1aa   :  { %v302_v60 = vpop.f32.mrb[2].mxu1 }
 0x1ab   :  { %v550_v61 = vpop.f32.mrb[3].mxu1 }
 0x1b0   :  { %v354_v62 = vpop.f32.mrb[4].mxu1 }
 0x1b1   :  { %v355_v0 = vadd.f32 %v354_v62, %v299_v58  ;;  %v557_v1 = vpop.f32.mrb[5].mxu1 }
 0x1b2   :  { %v357_v2 = vpop.f32.mrb[6].mxu1 }
 0x1b3   :  { %v367_v4 = vadd.f32 %v517_v63, %v355_v0  ;;  %v558_v5 = vpop.f32.mrb[7].mxu1 }
 0x1b5   :  { %v518_v6 = vmul.f32 -1.442695, %v367_v4 }
 0x1b7   :  { %612 = vpow2.f32 %v518_v6 }
 0x1c1   :  { %v613_v7 = vpop.eup %612 }
 0x1c2   :  { %v371_v8 = vadd.f32 1.0, %v613_v7 }
 0x1c4   :  { %614 = vrcp.f32 %v371_v8 }
 0x1ce   :  { %v615_v3 = vpop.eup %614 }
 0x1cf   :  { %v374_v9 = vmul.f32 %v615_v3, %v367_v4 }
 0x1d1   :  { %v375_v10 = vpack.c.bf16 %v374_v9, %v374_v9 }
 0x1d3   :  { %576 = vmatmul.mubr.bf16.vlgmr.msra.gmra.mrb[0].mxu0 %v375_v10 }
 0x2a6   :  { %v481_v13 = vpop.f32.mrb[0].mxu0 }
 0x2a7   :  { %v482_v14 = vadd.f32 %v519_v11, %v481_v13  ;;  %v577_v15 = vpop.f32.mrb[1].mxu0 }
 0x2a8   :  { %v484_v16 = vpop.f32.mrb[2].mxu0 }
 0x2a9   :  { %v578_v18 = vpop.f32.mrb[3].mxu0  ;;  %488 = vst.msk [vmem:[#allocation2] sm:$0xff] %vm487_vm0, %v482_v14 }
 0x2aa   :  { %627 = shalt.err (!%p624_p4)
}
 0x2ab   :  { %s628_s2 = scalar_lea.hbm %s779_s4, 128 }
 0x2ac   :  { %p629_p5 = scmp.ne.s32.totalorder %s779_s4, %s628_s2  ;;  %p632_p6 = scmp.lt.u32.totalorder %s628_s2, %s779_s4 }
 0x2ae   :  { %p634_p7 = pnand %p632_p6, %p629_p5 }
 0x2b0   :  { %637 = shalt.err (!%p634_p7)
}
 0x2b1   :  { %498 = dma.vmem_to_hbm [thread:$0]  %s496_s17, 128, %s779_s4, [#allocation3]  }
 0x2b2   :  { %638 = dma.done.wait [#allocation3], 128  }
 0x2b3   :  { %639 = vsyncadd [#allocation3], 4294967168 }
 0x2b4   :  { %502 = vsyncpa [#allocation3], 1 }

</bundles_post_ra>
